<compile_context>
chip_gen: v7x
topology: tpu7x:2x2x1
jax: 0.10.0
libtpu: 0.0.40
codegen_flags: <defaults>
</compile_context>

<pallas_src>
import jax
import jax.numpy as jnp
from jax.experimental import pallas as pl
from jax.experimental.pallas import tpu as pltpu


def _model_kernel(feat_ref, gdv_ref, pr_ref,
                  w_feat_ref, w_gdv_ref, w_pr_ref, b_enc_ref,
                  w_ode_ref, b_ode_ref,
                  w_dec_ref, b_dec_ref,
                  out_ref):
    # ---- EncodingLayer: Linear over concat(feat, gdv, pr) + ReLU; concat fused ----
    enc = jnp.dot(feat_ref[...], w_feat_ref[...], preferred_element_type=jnp.float32)
    enc = enc + jnp.dot(gdv_ref[...], w_gdv_ref[...], preferred_element_type=jnp.float32)
    enc = enc + pr_ref[...] * w_pr_ref[...]          # K=1 contraction as a VPU broadcast
    enc = jnp.maximum(enc + b_enc_ref[...], 0.0)     # (T*N, D)

    # ---- ODEBlock: residual explicit-Euler step with tanh dynamics ----
    dyn = jnp.dot(enc, w_ode_ref[...], preferred_element_type=jnp.float32)
    ode = enc + jnp.tanh(dyn + b_ode_ref[...])       # (T*N, D)

    # ---- DecodingLayer: Linear; output width padded to 128 lanes -> unmasked stores ----
    dec = jnp.dot(ode, w_dec_ref[...], preferred_element_type=jnp.float32)
    out_ref[...] = (dec + b_dec_ref[...]).astype(out_ref.dtype)   # (T*N, DP)


def mymodel_forward(feat, gdv, pr, params):
    """feat: [T,N,F], gdv: [T,N,G], pr: [T,N,1] -> [T,N,D] node embeddings."""
    T, N, F = feat.shape
    G = gdv.shape[-1]
    D = params["w_enc"].shape[1]
    TN = T * N
    f32 = jnp.float32

    # Fold time into the matmul M dimension (free, contiguous reshapes).
    feat2 = feat.reshape(TN, F).astype(f32)
    gdv2 = gdv.reshape(TN, G).astype(f32)
    pr2 = pr.reshape(TN, 1).astype(f32)

    # Split W_enc row-wise so the (feat, gdv, pr) concat is fused into the matmul.
    w_enc = params["w_enc"].astype(f32)
    w_feat, w_gdv, w_pr = w_enc[:F], w_enc[F:F + G], w_enc[F + G:]

    # Pad the decoder output width to a multiple of 128 for lane-dense stores.
    DP = ((D + 127) // 128) * 128
    w_dec = jnp.pad(params["w_dec"].astype(f32), ((0, 0), (0, DP - D)))
    b_dec = jnp.pad(params["b_dec"].astype(f32), ((0, 0), (0, DP - D)))

    full = lambda shape: pl.BlockSpec(shape, lambda i: (0,) * len(shape))

    out = pl.pallas_call(
        _model_kernel,
        out_shape=jax.ShapeDtypeStruct((TN, DP), f32),
        grid=(1,),                 # single invocation: M = T*N fills the MXU
        in_specs=[
            full((TN, F)), full((TN, G)), full((TN, 1)),
            full((F, D)), full((G, D)), full((1, D)), full((1, D)),
            full((D, D)), full((1, D)),
            full((D, DP)), full((1, DP)),
        ],
        out_specs=full((TN, DP)),
        compiler_params=pltpu.CompilerParams(
            dimension_semantics=("arbitrary",)),
    )(feat2, gdv2, pr2,
      w_feat, w_gdv, w_pr, params["b_enc"].astype(f32),
      params["w_ode"].astype(f32), params["b_ode"].astype(f32),
      w_dec, b_dec)

    # Drop the lane padding and restore the [T, N, D] layout.
    return out[:, :D].reshape(T, N, D)


def init_params(key, num_feat, num_gdv, d):
    """Glorot-uniform-style init mirroring reset_parameters()."""
    fin = num_feat + num_gdv + 1
    k1, k2, k3 = jax.random.split(key, 3)

    def glorot(k, shape):
        limit = (6.0 / (shape[0] + shape[1])) ** 0.5
        return jax.random.uniform(k, shape, jnp.float32, -limit, limit)

    return {
        "w_enc": glorot(k1, (fin, d)),
        "b_enc": jnp.zeros((1, d), jnp.float32),
        "w_ode": glorot(k2, (d, d)),
        "b_ode": jnp.zeros((1, d), jnp.float32),
        "w_dec": glorot(k3, (d, d)),
        "b_dec": jnp.zeros((1, d), jnp.float32),
    }


if __name__ == "__main__":
    # time_length = 9, tasktype != 'multisteps' -> num_time_steps T = 8
    # N = 16 nodes, num_feat = 8, num_gdv = 7, num_pr = 1, encoding_layer_config D = 32
    time_length = 9
    T = time_length - 1
    N, num_feat, num_gdv, num_pr, D = 16, 8, 7, 1, 32

    key = jax.random.PRNGKey(0)
    kf, kg, kp, kw = jax.random.split(key, 4)
    feat = jax.random.normal(kf, (T, N, num_feat), jnp.float32)
    gdv = jax.random.normal(kg, (T, N, num_gdv), jnp.float32)
    pr = jax.random.uniform(kp, (T, N, num_pr), jnp.float32)

    params = init_params(kw, num_feat, num_gdv, D)

    fwd = jax.jit(mymodel_forward)
    out = fwd(feat, gdv, pr, params)
    jax.block_until_ready(out)

    # Sanity check against a pure-JAX reference of the same math.
    x = jnp.concatenate([feat, gdv, pr], axis=-1)
    enc = jnp.maximum(x @ params["w_enc"] + params["b_enc"], 0.0)
    ode = enc + jnp.tanh(enc @ params["w_ode"] + params["b_ode"])
    ref = ode @ params["w_dec"] + params["b_dec"]
    assert out.shape == (T, N, D)
    assert jnp.allclose(out, ref, atol=1e-4, rtol=1e-4), \
        float(jnp.max(jnp.abs(out - ref)))

    print("KERNEL_OK")
</pallas_src>

<mosaic_0001>
module attributes {stable_mosaic.version = 11 : i64} {
  func.func @_model_kernel(%arg0: i32, %arg1: memref<128x8xf32, #tpu.memory_space<vmem>>, %arg2: memref<128x7xf32, #tpu.memory_space<vmem>>, %arg3: memref<128x1xf32, #tpu.memory_space<vmem>>, %arg4: memref<8x32xf32, #tpu.memory_space<vmem>>, %arg5: memref<7x32xf32, #tpu.memory_space<vmem>>, %arg6: memref<1x32xf32, #tpu.memory_space<vmem>>, %arg7: memref<1x32xf32, #tpu.memory_space<vmem>>, %arg8: memref<32x32xf32, #tpu.memory_space<vmem>>, %arg9: memref<1x32xf32, #tpu.memory_space<vmem>>, %arg10: memref<32x128xf32, #tpu.memory_space<vmem>>, %arg11: memref<1x128xf32, #tpu.memory_space<vmem>>, %arg12: memref<128x128xf32, #tpu.memory_space<vmem>>) attributes {dimension_semantics = [#tpu.dimension_semantics<arbitrary>], iteration_bounds = array<i64: 1>, scalar_prefetch = 0 : i64, scratch_operands = 0 : i64, tpu.core_type = #tpu.core_type<tc>, window_params = [{pipeline_mode = #tpu.pipeline_mode<synchronous>, transform_indices = @transform_0, window_bounds = array<i64: 128, 8>}, {pipeline_mode = #tpu.pipeline_mode<synchronous>, transform_indices = @transform_1, window_bounds = array<i64: 128, 7>}, {pipeline_mode = #tpu.pipeline_mode<synchronous>, transform_indices = @transform_2, window_bounds = array<i64: 128, 1>}, {pipeline_mode = #tpu.pipeline_mode<synchronous>, transform_indices = @transform_3, window_bounds = array<i64: 8, 32>}, {pipeline_mode = #tpu.pipeline_mode<synchronous>, transform_indices = @transform_4, window_bounds = array<i64: 7, 32>}, {pipeline_mode = #tpu.pipeline_mode<synchronous>, transform_indices = @transform_5, window_bounds = array<i64: 1, 32>}, {pipeline_mode = #tpu.pipeline_mode<synchronous>, transform_indices = @transform_6, window_bounds = array<i64: 1, 32>}, {pipeline_mode = #tpu.pipeline_mode<synchronous>, transform_indices = @transform_7, window_bounds = array<i64: 32, 32>}, {pipeline_mode = #tpu.pipeline_mode<synchronous>, transform_indices = @transform_8, window_bounds = array<i64: 1, 32>}, {pipeline_mode = #tpu.pipeline_mode<synchronous>, transform_indices = @transform_9, window_bounds = array<i64: 32, 128>}, {pipeline_mode = #tpu.pipeline_mode<synchronous>, transform_indices = @transform_10, window_bounds = array<i64: 1, 128>}, {pipeline_mode = #tpu.pipeline_mode<synchronous>, transform_indices = @transform_11, window_bounds = array<i64: 128, 128>}]} {
    %c0 = arith.constant 0 : index
    %c0_0 = arith.constant 0 : index
    %0 = vector.load %arg1[%c0, %c0_0] : memref<128x8xf32, #tpu.memory_space<vmem>>, vector<128x8xf32>
    %c0_1 = arith.constant 0 : index
    %c0_2 = arith.constant 0 : index
    %1 = vector.load %arg4[%c0_1, %c0_2] : memref<8x32xf32, #tpu.memory_space<vmem>>, vector<8x32xf32>
    %cst = arith.constant dense<0.000000e+00> : vector<128x32xf32>
    %2 = tpu.matmul %0, %1, %cst {dimension_numbers = #tpu.dot_dimension_numbers<[1], [0], [0], [1], [0, 0, 1, 1], [], []>} : vector<128x8xf32>, vector<8x32xf32>, vector<128x32xf32> -> vector<128x32xf32>
    %c0_3 = arith.constant 0 : index
    %c0_4 = arith.constant 0 : index
    %3 = vector.load %arg2[%c0_3, %c0_4] : memref<128x7xf32, #tpu.memory_space<vmem>>, vector<128x7xf32>
    %c0_5 = arith.constant 0 : index
    %c0_6 = arith.constant 0 : index
    %4 = vector.load %arg5[%c0_5, %c0_6] : memref<7x32xf32, #tpu.memory_space<vmem>>, vector<7x32xf32>
    %cst_7 = arith.constant dense<0.000000e+00> : vector<128x32xf32>
    %5 = tpu.matmul %3, %4, %cst_7 {dimension_numbers = #tpu.dot_dimension_numbers<[1], [0], [0], [1], [0, 0, 1, 1], [], []>} : vector<128x7xf32>, vector<7x32xf32>, vector<128x32xf32> -> vector<128x32xf32>
    %6 = arith.addf %2, %5 : vector<128x32xf32>
    %c0_8 = arith.constant 0 : index
    %c0_9 = arith.constant 0 : index
    %7 = vector.load %arg3[%c0_8, %c0_9] : memref<128x1xf32, #tpu.memory_space<vmem>>, vector<128x1xf32>
    %c0_10 = arith.constant 0 : index
    %c0_11 = arith.constant 0 : index
    %8 = vector.load %arg6[%c0_10, %c0_11] : memref<1x32xf32, #tpu.memory_space<vmem>>, vector<1x32xf32>
    %9 = vector.broadcast %7 : vector<128x1xf32> to vector<128x32xf32>
    %10 = vector.broadcast %8 : vector<1x32xf32> to vector<128x32xf32>
    %11 = arith.mulf %9, %10 : vector<128x32xf32>
    %12 = arith.addf %6, %11 : vector<128x32xf32>
    %c0_12 = arith.constant 0 : index
    %c0_13 = arith.constant 0 : index
    %13 = vector.load %arg7[%c0_12, %c0_13] : memref<1x32xf32, #tpu.memory_space<vmem>>, vector<1x32xf32>
    %14 = vector.broadcast %13 : vector<1x32xf32> to vector<128x32xf32>
    %15 = arith.addf %12, %14 : vector<128x32xf32>
    %cst_14 = arith.constant 0.000000e+00 : f32
    %16 = vector.broadcast %cst_14 : f32 to vector<128x32xf32>
    %17 = arith.maximumf %15, %16 : vector<128x32xf32>
    %c0_15 = arith.constant 0 : index
    %c0_16 = arith.constant 0 : index
    %18 = vector.load %arg8[%c0_15, %c0_16] : memref<32x32xf32, #tpu.memory_space<vmem>>, vector<32x32xf32>
    %cst_17 = arith.constant dense<0.000000e+00> : vector<128x32xf32>
    %19 = tpu.matmul %17, %18, %cst_17 {dimension_numbers = #tpu.dot_dimension_numbers<[1], [0], [0], [1], [0, 0, 1, 1], [], []>} : vector<128x32xf32>, vector<32x32xf32>, vector<128x32xf32> -> vector<128x32xf32>
    %c0_18 = arith.constant 0 : index
    %c0_19 = arith.constant 0 : index
    %20 = vector.load %arg9[%c0_18, %c0_19] : memref<1x32xf32, #tpu.memory_space<vmem>>, vector<1x32xf32>
    %21 = vector.broadcast %20 : vector<1x32xf32> to vector<128x32xf32>
    %22 = arith.addf %19, %21 : vector<128x32xf32>
    %23 = math.tanh %22 : vector<128x32xf32>
    %24 = arith.addf %17, %23 : vector<128x32xf32>
    %c0_20 = arith.constant 0 : index
    %c0_21 = arith.constant 0 : index
    %25 = vector.load %arg10[%c0_20, %c0_21] : memref<32x128xf32, #tpu.memory_space<vmem>>, vector<32x128xf32>
    %cst_22 = arith.constant dense<0.000000e+00> : vector<128x128xf32>
    %26 = tpu.matmul %24, %25, %cst_22 {dimension_numbers = #tpu.dot_dimension_numbers<[1], [0], [0], [1], [0, 0, 1, 1], [], []>} : vector<128x32xf32>, vector<32x128xf32>, vector<128x128xf32> -> vector<128x128xf32>
    %c0_23 = arith.constant 0 : index
    %c0_24 = arith.constant 0 : index
    %27 = vector.load %arg11[%c0_23, %c0_24] : memref<1x128xf32, #tpu.memory_space<vmem>>, vector<1x128xf32>
    %28 = vector.broadcast %27 : vector<1x128xf32> to vector<128x128xf32>
    %29 = arith.addf %26, %28 : vector<128x128xf32>
    %c0_25 = arith.constant 0 : index
    %c0_26 = arith.constant 0 : index
    %30 = vector.load %arg12[%c0_25, %c0_26] : memref<128x128xf32, #tpu.memory_space<vmem>>, vector<128x128xf32>
    tpu.vector_store %arg12[%c0_25, %c0_26], %29 {strides = array<i32>} : memref<128x128xf32, #tpu.memory_space<vmem>>, vector<128x128xf32>,
    return
  }
  func.func @transform_0(%arg0: i32) -> (i32, i32) {
    %c0_i32 = arith.constant 0 : i32
    %c0_i32_0 = arith.constant 0 : i32
    %c0_i32_1 = arith.constant 0 : i32
    return %c0_i32, %c0_i32_0 : i32, i32
  }
  func.func @transform_1(%arg0: i32) -> (i32, i32) {
    %c0_i32 = arith.constant 0 : i32
    %c0_i32_0 = arith.constant 0 : i32
    %c0_i32_1 = arith.constant 0 : i32
    return %c0_i32, %c0_i32_0 : i32, i32
  }
  func.func @transform_2(%arg0: i32) -> (i32, i32) {
    %c0_i32 = arith.constant 0 : i32
    %c0_i32_0 = arith.constant 0 : i32
    %c0_i32_1 = arith.constant 0 : i32
    return %c0_i32, %c0_i32_0 : i32, i32
  }
  func.func @transform_3(%arg0: i32) -> (i32, i32) {
    %c0_i32 = arith.constant 0 : i32
    %c0_i32_0 = arith.constant 0 : i32
    %c0_i32_1 = arith.constant 0 : i32
    return %c0_i32, %c0_i32_0 : i32, i32
  }
  func.func @transform_4(%arg0: i32) -> (i32, i32) {
    %c0_i32 = arith.constant 0 : i32
    %c0_i32_0 = arith.constant 0 : i32
    %c0_i32_1 = arith.constant 0 : i32
    return %c0_i32, %c0_i32_0 : i32, i32
  }
  func.func @transform_5(%arg0: i32) -> (i32, i32) {
    %c0_i32 = arith.constant 0 : i32
    %c0_i32_0 = arith.constant 0 : i32
    %c0_i32_1 = arith.constant 0 : i32
    return %c0_i32, %c0_i32_0 : i32, i32
  }
  func.func @transform_6(%arg0: i32) -> (i32, i32) {
    %c0_i32 = arith.constant 0 : i32
    %c0_i32_0 = arith.constant 0 : i32
    %c0_i32_1 = arith.constant 0 : i32
    return %c0_i32, %c0_i32_0 : i32, i32
  }
  func.func @transform_7(%arg0: i32) -> (i32, i32) {
    %c0_i32 = arith.constant 0 : i32
    %c0_i32_0 = arith.constant 0 : i32
    %c0_i32_1 = arith.constant 0 : i32
    return %c0_i32, %c0_i32_0 : i32, i32
  }
  func.func @transform_8(%arg0: i32) -> (i32, i32) {
    %c0_i32 = arith.constant 0 : i32
    %c0_i32_0 = arith.constant 0 : i32
    %c0_i32_1 = arith.constant 0 : i32
    return %c0_i32, %c0_i32_0 : i32, i32
  }
  func.func @transform_9(%arg0: i32) -> (i32, i32) {
    %c0_i32 = arith.constant 0 : i32
    %c0_i32_0 = arith.constant 0 : i32
    %c0_i32_1 = arith.constant 0 : i32
    return %c0_i32, %c0_i32_0 : i32, i32
  }
  func.func @transform_10(%arg0: i32) -> (i32, i32) {
    %c0_i32 = arith.constant 0 : i32
    %c0_i32_0 = arith.constant 0 : i32
    %c0_i32_1 = arith.constant 0 : i32
    return %c0_i32, %c0_i32_0 : i32, i32
  }
  func.func @transform_11(%arg0: i32) -> (i32, i32) {
    %c0_i32 = arith.constant 0 : i32
    %c0_i32_0 = arith.constant 0 : i32
    %c0_i32_1 = arith.constant 0 : i32
    return %c0_i32, %c0_i32_0 : i32, i32
  }
}

</mosaic_0001>

<bundles_post_ra>
// kernel: mymodel_forward.1
= control target key start
LH: loop header
LB: loop body
LE: loop exit
PB: predicated region body
PF: predicated region fallthrough
CT: control target
= control target key end

     0   :  { %vm122_vm0 = vcmask 1046528   ;;  %vm73_vm1 = vcmask 56320   ;;  %v1465_v5 = vmov 0   ;;  %s1957_s0 = inlined_call_operand.vmem [shape: f32[128,8], index: 0, kind: input, shape index: {}]   ;;  %s1958_s1 = inlined_call_operand.vmem [shape: f32[128,7], index: 1, kind: input, shape index: {}]   ;;  %s1959_s2 = inlined_call_operand.vmem [shape: f32[128,1], index: 2, kind: input, shape index: {}]   ;;  %s1960_s3 = inlined_call_operand.vmem [shape: f32[8,32], index: 3, kind: input, shape index: {}]   ;;  %s1961_s4 = inlined_call_operand.vmem [shape: f32[7,32], index: 4, kind: input, shape index: {}]   ;;  %s1962_s5 = inlined_call_operand.vmem [shape: f32[1,32], index: 5, kind: input, shape index: {}]   ;;  %s1963_s6 = inlined_call_operand.vmem [shape: f32[1,32], index: 6, kind: input, shape index: {}]   ;;  %s1964_s7 = inlined_call_operand.vmem [shape: f32[32,32], index: 7, kind: input, shape index: {}]   ;;  %s1965_s8 = inlined_call_operand.vmem [shape: f32[1,32], index: 8, kind: input, shape index: {}]   ;;  %s1966_s9 = inlined_call_operand.vmem [shape: f32[32,128], index: 9, kind: input, shape index: {}]   ;;  %s1967_s10 = inlined_call_operand.vmem [shape: f32[1,128], index: 10, kind: input, shape index: {}]   ;;  %s1968_s11 = inlined_call_operand.hbm [shape: f32[128,128], index: 11, kind: output, shape index: {}]  }
   0x1   :  { %v72_v0 = vld [vmem:[%s1961_s4] sm:$0x7f]  ;;  %v57_v2 = vld [vmem:[%s1958_s1 + $0x8] sm:$0xff]  ;;  %v58_v4 = vld [vmem:[%s1958_s1 + $0x10] sm:$0xff]  ;;  %1407 = vset.pattern.permute.xlu0 %v1465_v5  ;;  %1408 = vset.pattern.permute.xlu1 %v1465_v5 }
   0x2   :  { %v56_v1 = vld [vmem:[%s1958_s1] sm:$0xff]  ;;  %1255 = vmatprep.subr.msk.mxu0 %vm122_vm0, %v72_v0  ;;  %v59_v6 = vld [vmem:[%s1958_s1 + $0x18] sm:$0xff]  ;;  %v61_v8 = vld [vmem:[%s1958_s1 + $0x28] sm:$0xff] }
   0x3   :  { %1257 = vmatprep.mubr.msk.f32.mxu0 %vm73_vm1, %v56_v1  ;;  %v55_v3 = vld [vmem:[%s1960_s3] sm:$0xff]  ;;  %1256 = vmatpush3.msk.msra.mxu0 %vm122_vm0, %v72_v0  ;;  %v62_v9 = vld [vmem:[%s1958_s1 + $0x30] sm:$0xff]  ;;  %v63_v12 = vld [vmem:[%s1958_s1 + $0x38] sm:$0xff] }
   0x4   :  { %1258 = vmatmul.mubr.msk.f32.vlgmr.msra.gmra.mrb[0].mxu0 %vm73_vm1, %v57_v2  ;;  %1281 = vmatprep.subr.mxu0 %v55_v3  ;;  %v60_v7 = vld [vmem:[%s1958_s1 + $0x20] sm:$0xff]  ;;  %v467_v11 = vld [vmem:[%s1959_s2 + $0x10] sm:$0xff]  ;;  %v466_v14 = vld [vmem:[%s1959_s2 + $0x8] sm:$0xff] }
   0x5   :  { %1282 = vmatpush3.msra.mxu0 %v55_v3  ;;  %1260 = vmatprep.mubr.msk.f32.mxu0 %vm73_vm1, %v58_v4  ;;  %v465_v10 = vld [vmem:[%s1959_s2] sm:$0xff]  ;;  %v468_v15 = vld [vmem:[%s1959_s2 + $0x18] sm:$0xff]  ;;  %v65_v16 = vld [vmem:[%s1958_s1 + $0x48] sm:$0xff] }
   0x6   :  { %484 = vperm.xlu0 %1407, %v465_v10   ;;  %v64_v13 = vld [vmem:[%s1958_s1 + $0x40] sm:$0xff]  ;;  %494 = vperm.xlu1 %1408, %v467_v11   ;;  %v66_v17 = vld [vmem:[%s1958_s1 + $0x50] sm:$0xff] }
   0x7   :  { %v469_v18 = vld [vmem:[%s1959_s2 + $0x20] sm:$0xff] }
   0x8   :  { %1261 = vmatmul.mubr.msk.f32.gmra.mrb[2].mxu0 %vm73_vm1, %v59_v6 }
   0x9   :  { %1263 = vmatprep.mubr.msk.f32.mxu0 %vm73_vm1, %v60_v7 }
   0xa   :  { %489 = vperm.xlu0 %1407, %v466_v14   ;;  %499 = vperm.xlu1 %1408, %v468_v15  }
   0xc   :  { %1264 = vmatmul.mubr.msk.f32.gmra.mrb[4].mxu0 %vm73_vm1, %v61_v8 }
   0xd   :  { %1266 = vmatprep.mubr.msk.f32.mxu0 %vm73_vm1, %v62_v9 }
  0x10   :  { %1267 = vmatmul.mubr.msk.f32.gmra.mrb[6].mxu0 %vm73_vm1, %v63_v12 }
  0x11   :  { %1269 = vmatprep.mubr.msk.f32.mxu0 %vm73_vm1, %v64_v13 }
  0x12   :  { %16 = vsyncpa [#allocation3], 0  ;;  %v470_v19 = vld [vmem:[%s1959_s2 + $0x28] sm:$0xff]  ;;  %v67_v20 = vld [vmem:[%s1958_s1 + $0x58] sm:$0xff]  ;;  %504 = vperm.xlu0 %1407, %v469_v18   ;;  %vm271_vm2 = vcmask 64512   ;;  %vm650_vm3 = vcmask 261120  }
  0x13   :  { %v68_v21 = vld [vmem:[%s1958_s1 + $0x60] sm:$0xff]  ;;  %509 = vperm.xlu1 %1408, %v470_v19   ;;  %v471_v22 = vld [vmem:[%s1959_s2 + $0x30] sm:$0xff]  ;;  %v472_v23 = vld [vmem:[%s1959_s2 + $0x38] sm:$0xff] }
  0x14   :  { %1270 = vmatmul.mubr.msk.f32.gmra.mrb[8].mxu0 %vm73_vm1, %v65_v16  ;;  %v69_v24 = vld [vmem:[%s1958_s1 + $0x68] sm:$0xff]  ;;  %v70_v25 = vld [vmem:[%s1958_s1 + $0x70] sm:$0xff]  ;;  %v473_v26 = vld [vmem:[%s1959_s2 + $0x40] sm:$0xff] }
  0x15   :  { %1272 = vmatprep.mubr.msk.f32.mxu0 %vm73_vm1, %v66_v17  ;;  %v474_v27 = vld [vmem:[%s1959_s2 + $0x48] sm:$0xff]  ;;  %v71_v28 = vld [vmem:[%s1958_s1 + $0x78] sm:$0xff]  ;;  %v39_v29 = vld [vmem:[%s1957_s0] sm:$0xff] }
  0x16   :  { %514 = vperm.xlu0 %1407, %v471_v22   ;;  %v475_v30 = vld [vmem:[%s1959_s2 + $0x50] sm:$0xff]  ;;  %v476_v31 = vld [vmem:[%s1959_s2 + $0x58] sm:$0xff]  ;;  %v40_v32 = vld [vmem:[%s1957_s0 + $0x8] sm:$0xff] }
  0x17   :  { %519 = vperm.xlu1 %1408, %v472_v23   ;;  %v41_v33 = vld [vmem:[%s1957_s0 + $0x10] sm:$0xff]  ;;  %v477_v34 = vld [vmem:[%s1959_s2 + $0x60] sm:$0xff]  ;;  %v478_v35 = vld [vmem:[%s1959_s2 + $0x68] sm:$0xff] }
  0x18   :  { %1273 = vmatmul.mubr.msk.f32.gmra.mrb[10].mxu0 %vm73_vm1, %v67_v20  ;;  %v42_v36 = vld [vmem:[%s1957_s0 + $0x18] sm:$0xff]  ;;  %v43_v37 = vld [vmem:[%s1957_s0 + $0x20] sm:$0xff]  ;;  %v479_v38 = vld [vmem:[%s1959_s2 + $0x70] sm:$0xff] }
  0x19   :  { %1275 = vmatprep.mubr.msk.f32.mxu0 %vm73_vm1, %v68_v21  ;;  %v480_v39 = vld [vmem:[%s1959_s2 + $0x78] sm:$0xff]  ;;  %v44_v40 = vld [vmem:[%s1957_s0 + $0x28] sm:$0xff]  ;;  %v45_v41 = vld [vmem:[%s1957_s0 + $0x30] sm:$0xff] }
  0x1a   :  { %524 = vperm.xlu0 %1407, %v473_v26   ;;  %v46_v42 = vld [vmem:[%s1957_s0 + $0x38] sm:$0xff]  ;;  %v47_v43 = vld [vmem:[%s1957_s0 + $0x40] sm:$0xff]  ;;  %v48_v44 = vld [vmem:[%s1957_s0 + $0x48] sm:$0xff] }
  0x1b   :  { %529 = vperm.xlu1 %1408, %v474_v27   ;;  %v49_v45 = vld [vmem:[%s1957_s0 + $0x50] sm:$0xff]  ;;  %v50_v46 = vld [vmem:[%s1957_s0 + $0x58] sm:$0xff]  ;;  %v51_v47 = vld [vmem:[%s1957_s0 + $0x60] sm:$0xff] }
  0x1c   :  { %1276 = vmatmul.mubr.msk.f32.gmra.mrb[12].mxu0 %vm73_vm1, %v69_v24  ;;  %v52_v48 = vld [vmem:[%s1957_s0 + $0x68] sm:$0xff]  ;;  %v53_v49 = vld [vmem:[%s1957_s0 + $0x70] sm:$0xff]  ;;  %v54_v50 = vld [vmem:[%s1957_s0 + $0x78] sm:$0xff] }
  0x1d   :  { %1278 = vmatprep.mubr.msk.f32.mxu0 %vm73_vm1, %v70_v25  ;;  %v639_v51 = vld [vmem:[%s1964_s7] sm:$0xff]  ;;  %v640_v52 = vld [vmem:[%s1964_s7 + $0x8] sm:$0xff]  ;;  %v641_v54 = vld [vmem:[%s1964_s7 + $0x10] sm:$0xff] }
  0x1e   :  { %534 = vperm.xlu0 %1407, %v475_v30   ;;  %v1371_v53 = vpack.c.bf16 %v640_v52, %v639_v51  ;;  %v642_v55 = vld [vmem:[%s1964_s7 + $0x18] sm:$0xff]  ;;  %v876_v57 = vld [vmem:[%s1966_s9] sm:$0xff]  ;;  %v877_v58 = vld [vmem:[%s1966_s9 + $0x8] sm:$0xff] }
  0x1f   :  { %539 = vperm.xlu1 %1408, %v476_v31   ;;  %v1375_v56 = vpack.c.bf16 %v642_v55, %v641_v54  ;;  %v1379_v59 = vpack.c.bf16 %v877_v58, %v876_v57  ;;  %v1732_v2 = vld [vmem:[%s1962_s5] ss:$0 sm:$0xff] }
  0x20   :  { %1279 = vmatmul.mubr.msk.f32.gmra.mrb[14].mxu0 %vm73_vm1, %v71_v28  ;;  %1372 = vmatprep.subr.bf16.mxu1 %v1371_v53  ;;  %v1739_v7 = vld [vmem:[%s1963_s6] ss:$0 sm:$0xff] }
  0x21   :  { %1283 = vmatprep.mubr.msk.f32.mxu0 %vm271_vm2, %v39_v29  ;;  %1374 = vmatpush3.bf16.msra.mxu1 %v1371_v53 }
  0x22   :  { %544 = vperm.xlu0 %1407, %v477_v34   ;;  %1376 = vmatprep.subr.bf16.mxu1 %v1375_v56 }
  0x23   :  { %549 = vperm.xlu1 %1408, %v478_v35  }
  0x24   :  { %1284 = vmatmul.mubr.msk.f32.vlgmr.msra.gmra.mrb[0].mxu0 %vm271_vm2, %v40_v32 }
  0x25   :  { %1286 = vmatprep.mubr.msk.f32.mxu0 %vm271_vm2, %v41_v33  ;;  %1378 = vmatpush3.bf16.msra.mxu1 %v1375_v56 }
  0x26   :  { %554 = vperm.xlu0 %1407, %v479_v38   ;;  %1380 = vmatprep.subr.bf16.mxu1 %v1379_v59 }
  0x27   :  { %559 = vperm.xlu1 %1408, %v480_v39  }
  0x28   :  { %1287 = vmatmul.mubr.msk.f32.gmra.mrb[2].mxu0 %vm271_vm2, %v42_v36 }
  0x29   :  { %1289 = vmatprep.mubr.msk.f32.mxu0 %vm271_vm2, %v43_v37 }
  0x2c   :  { %1290 = vmatmul.mubr.msk.f32.gmra.mrb[4].mxu0 %vm271_vm2, %v44_v40 }
  0x2d   :  { %1292 = vmatprep.mubr.msk.f32.mxu0 %vm271_vm2, %v45_v41 }
  0x30   :  { %1293 = vmatmul.mubr.msk.f32.gmra.mrb[6].mxu0 %vm271_vm2, %v46_v42 }
  0x31   :  { %1295 = vmatprep.mubr.msk.f32.mxu0 %vm271_vm2, %v47_v43 }
  0x34   :  { %1296 = vmatmul.mubr.msk.f32.gmra.mrb[8].mxu0 %vm271_vm2, %v48_v44 }
  0x35   :  { %1298 = vmatprep.mubr.msk.f32.mxu0 %vm271_vm2, %v49_v45 }
  0x38   :  { %1299 = vmatmul.mubr.msk.f32.gmra.mrb[10].mxu0 %vm271_vm2, %v50_v46 }
  0x39   :  { %1301 = vmatprep.mubr.msk.f32.mxu0 %vm271_vm2, %v51_v47 }
  0x3c   :  { %1302 = vmatmul.mubr.msk.f32.gmra.mrb[12].mxu0 %vm271_vm2, %v52_v48 }
  0x3d   :  { %1304 = vmatprep.mubr.msk.f32.mxu0 %vm271_vm2, %v53_v49 }
  0x40   :  { %1305 = vmatmul.mubr.msk.f32.gmra.mrb[14].mxu0 %vm271_vm2, %v54_v50 }
  0x85   :  { %v495_v60 = vpop.permute.xlu1 %494  ;;  %v485_v61 = vpop.permute.xlu0 %484 }
  0x86   :  { %v568_v4 = vmul.f32 %v1732_v2, %v485_v61  ;;  %v570_v14 = vmul.f32 %v1732_v2, %v495_v60 }
  0x89   :  { %v500_v62 = vpop.permute.xlu1 %499  ;;  %v490_v63 = vpop.permute.xlu0 %489 }
  0x8a   :  { %v569_v3 = vmul.f32 %v1732_v2, %v490_v63  ;;  %v571_v12 = vmul.f32 %v1732_v2, %v500_v62 }
  0x91   :  { %v505_v1 = vpop.permute.xlu0 %504 }
  0x92   :  { %v510_v0 = vpop.permute.xlu1 %509  ;;  %v572_v26 = vmul.f32 %v1732_v2, %v505_v1 }
  0x93   :  { %v573_v22 = vmul.f32 %v1732_v2, %v510_v0 }
  0x95   :  { %v515_v8 = vpop.permute.xlu0 %514 }
  0x96   :  { %v520_v5 = vpop.permute.xlu1 %519  ;;  %v574_v36 = vmul.f32 %v1732_v2, %v515_v8 }
  0x97   :  { %v575_v33 = vmul.f32 %v1732_v2, %v520_v5 }
  0x99   :  { %v525_v23 = vpop.permute.xlu0 %524 }
  0x9a   :  { %v530_v19 = vpop.permute.xlu1 %529  ;;  %v576_v48 = vmul.f32 %v1732_v2, %v525_v23 }
  0x9b   :  { %v577_v45 = vmul.f32 %v1732_v2, %v530_v19 }
  0x9d   :  { %v535_v40 = vpop.permute.xlu0 %534 }
  0x9e   :  { %v540_v37 = vpop.permute.xlu1 %539  ;;  %v578_v60 = vmul.f32 %v1732_v2, %v535_v40 }
  0x9f   :  { %v579_v56 = vmul.f32 %v1732_v2, %v540_v37 }
  0xa1   :  { %v545_v57 = vpop.permute.xlu0 %544 }
  0xa2   :  { %v550_v53 = vpop.permute.xlu1 %549  ;;  %v580_v8 = vmul.f32 %v1732_v2, %v545_v57 }
  0xf7   :  { %v1285_v6 = vpop.f32.mrb[0].mxu0 }
  0xf8   :  { %v585_v9 = vadd.f32 %v1285_v6, %v569_v3  ;;  %v386_v10 = vpop.f32.mrb[1].mxu0 }
  0xf9   :  { %v584_v11 = vadd.f32 %v568_v4, %v386_v10  ;;  %v581_v4 = vmul.f32 %v1732_v2, %v550_v53 }
  0xfa   :  { %v1743_v13 = vadd.f32 %v1739_v7, %v585_v9  ;;  %v560_v9 = vpop.permute.xlu1 %559 }
  0xfb   :  { %v1288_v15 = vpop.f32.mrb[2].mxu0  ;;  %v1747_v16 = vadd.f32 %v1739_v7, %v584_v11  ;;  %v583_v19 = vmul.f32 %v1732_v2, %v560_v9 }
  0xfc   :  { %v587_v17 = vadd.f32 %v1288_v15, %v571_v12  ;;  %v396_v18 = vpop.f32.mrb[3].mxu0  ;;  %v624_v24 = vmax.f32 %v1743_v13, 0.0  ;;  %v555_v12 = vpop.permute.xlu0 %554 }
  0xfd   :  { %v586_v20 = vadd.f32 %v570_v14, %v396_v18  ;;  %v623_v21 = vmax.f32 %v1747_v16, 0.0  ;;  %v582_v23 = vmul.f32 %v1732_v2, %v555_v12 }
  0xfe   :  { %v1753_v25 = vadd.f32 %v1739_v7, %v587_v17 }
  0xff   :  { %v1757_v27 = vadd.f32 %v1739_v7, %v586_v20  ;;  %v1291_v28 = vpop.f32.mrb[4].mxu0  ;;  %1315 = vmatprep.mubr.msk.f32.mxu1 %vm650_vm3, %v623_v21 }
 0x100   :  { %v589_v29 = vadd.f32 %v1291_v28, %v573_v22  ;;  %v406_v30 = vpop.f32.mrb[5].mxu0  ;;  %1316 = vmatmul.mubr.msk.f32.vlgmr.msra.gmra.mrb[0].mxu1 %vm650_vm3, %v624_v24  ;;  %v626_v34 = vmax.f32 %v1753_v25, 0.0 }
 0x101   :  { %v625_v31 = vmax.f32 %v1757_v27, 0.0  ;;  %v588_v32 = vadd.f32 %v572_v26, %v406_v30  ;;  %1382 = vmatpush3.bf16.msra.mxu1 %v1379_v59 }
 0x102   :  { %v1769_v35 = vadd.f32 %v1739_v7, %v589_v29 }
 0x103   :  { %v1773_v38 = vadd.f32 %v1739_v7, %v588_v32  ;;  %v1294_v39 = vpop.f32.mrb[6].mxu0  ;;  %1318 = vmatprep.mubr.msk.f32.mxu1 %vm650_vm3, %v625_v31 }
 0x104   :  { %v591_v41 = vadd.f32 %v1294_v39, %v575_v33  ;;  %v416_v42 = vpop.f32.mrb[7].mxu0  ;;  %1319 = vmatmul.mubr.msk.f32.gmra.mrb[2].mxu1 %vm650_vm3, %v626_v34  ;;  %v628_v46 = vmax.f32 %v1769_v35, 0.0 }
 0x105   :  { %v627_v43 = vmax.f32 %v1773_v38, 0.0  ;;  %v590_v44 = vadd.f32 %v574_v36, %v416_v42 }
 0x106   :  { %v1785_v47 = vadd.f32 %v1739_v7, %v591_v41  ;;  %v879_v41 = vld [vmem:[%s1966_s9 + $0x18] sm:$0xff] }
 0x107   :  { %v1789_v49 = vadd.f32 %v1739_v7, %v590_v44  ;;  %v1297_v50 = vpop.f32.mrb[8].mxu0  ;;  %1321 = vmatprep.mubr.msk.f32.mxu1 %vm650_vm3, %v627_v43  ;;  %v1876_v44 = vld [vmem:[%s1965_s8] ss:$0 sm:$0xff] }
 0x108   :  { %v593_v51 = vadd.f32 %v1297_v50, %v577_v45  ;;  %v426_v52 = vpop.f32.mrb[9].mxu0  ;;  %1322 = vmatmul.mubr.msk.f32.gmra.mrb[4].mxu1 %vm650_vm3, %v628_v46  ;;  %v630_v58 = vmax.f32 %v1785_v47, 0.0 }
 0x109   :  { %v629_v54 = vmax.f32 %v1789_v49, 0.0  ;;  %v592_v55 = vadd.f32 %v576_v48, %v426_v52 }
 0x10a   :  { %v1801_v59 = vadd.f32 %v1739_v7, %v593_v51 }
 0x10b   :  { %v1805_v61 = vadd.f32 %v1739_v7, %v592_v55  ;;  %v1300_v62 = vpop.f32.mrb[10].mxu0  ;;  %1324 = vmatprep.mubr.msk.f32.mxu1 %vm650_vm3, %v629_v54 }
 0x10c   :  { %v595_v63 = vadd.f32 %v1300_v62, %v579_v56  ;;  %v436_v0 = vpop.f32.mrb[11].mxu0  ;;  %1325 = vmatmul.mubr.msk.f32.gmra.mrb[6].mxu1 %vm650_vm3, %v630_v58  ;;  %v632_v5 = vmax.f32 %v1801_v59, 0.0 }
 0x10d   :  { %v631_v1 = vmax.f32 %v1805_v61, 0.0  ;;  %v594_v3 = vadd.f32 %v578_v60, %v436_v0 }
 0x10e   :  { %v1817_v6 = vadd.f32 %v1739_v7, %v595_v63 }
 0x10f   :  { %v1821_v10 = vadd.f32 %v1739_v7, %v594_v3  ;;  %v1303_v11 = vpop.f32.mrb[12].mxu0  ;;  %1327 = vmatprep.mubr.msk.f32.mxu1 %vm650_vm3, %v631_v1 }
 0x110   :  { %v597_v14 = vadd.f32 %v1303_v11, %v581_v4  ;;  %v446_v15 = vpop.f32.mrb[13].mxu0  ;;  %1328 = vmatmul.mubr.msk.f32.gmra.mrb[8].mxu1 %vm650_vm3, %v632_v5  ;;  %v634_v20 = vmax.f32 %v1817_v6, 0.0 }
 0x111   :  { %v633_v17 = vmax.f32 %v1821_v10, 0.0  ;;  %v596_v18 = vadd.f32 %v580_v8, %v446_v15 }
 0x112   :  { %v1833_v22 = vadd.f32 %v1739_v7, %v597_v14 }
 0x113   :  { %v1837_v26 = vadd.f32 %v1739_v7, %v596_v18  ;;  %v1306_v28 = vpop.f32.mrb[14].mxu0  ;;  %1330 = vmatprep.mubr.msk.f32.mxu1 %vm650_vm3, %v633_v17 }
 0x114   :  { %v599_v29 = vadd.f32 %v1306_v28, %v583_v19  ;;  %v456_v30 = vpop.f32.mrb[15].mxu0  ;;  %1331 = vmatmul.mubr.msk.f32.gmra.mrb[10].mxu1 %vm650_vm3, %v634_v20  ;;  %v636_v36 = vmax.f32 %v1833_v22, 0.0 }
 0x115   :  { %v635_v32 = vmax.f32 %v1837_v26, 0.0  ;;  %v598_v33 = vadd.f32 %v582_v23, %v456_v30 }
 0x116   :  { %v1848_v2 = vadd.f32 %v1739_v7, %v599_v29 }
 0x117   :  { %v1851_v37 = vadd.f32 %v1739_v7, %v598_v33  ;;  %1333 = vmatprep.mubr.msk.f32.mxu1 %vm650_vm3, %v635_v32  ;;  %v878_v7 = vld [vmem:[%s1966_s9 + $0x10] sm:$0xff] }
 0x118   :  { %1334 = vmatmul.mubr.msk.f32.gmra.mrb[12].mxu1 %vm650_vm3, %v636_v36  ;;  %v638_v40 = vmax.f32 %v1848_v2, 0.0  ;;  %v1383_v42 = vpack.c.bf16 %v879_v41, %v878_v7 }
 0x119   :  { %v637_v39 = vmax.f32 %v1851_v37, 0.0 }
 0x11a   :  { %1384 = vmatprep.subr.bf16.mxu1 %v1383_v42 }
 0x11b   :  { %1336 = vmatprep.mubr.msk.f32.mxu1 %vm650_vm3, %v637_v39  ;;  %1386 = vmatpush3.bf16.msra.mxu1 %v1383_v42 }
 0x11c   :  { %1337 = vmatmul.mubr.msk.f32.gmra.mrb[14].mxu1 %vm650_vm3, %v638_v40 }
 0x1d3   :  { %v1317_v45 = vpop.f32.mrb[0].mxu1 }
 0x1d4   :  { %v771_v48 = vadd.f32 %v1317_v45, %v1876_v44  ;;  %v765_v50 = vpop.f32.mrb[1].mxu1 }
 0x1d5   :  { %v766_v51 = vadd.f32 %v1876_v44, %v765_v50 }
 0x1d6   :  { %1409 = vtanh.f32 %v771_v48 }
 0x1d7   :  { %1411 = vtanh.f32 %v766_v51  ;;  %v1320_v52 = vpop.f32.mrb[2].mxu1 }
 0x1d8   :  { %v781_v53 = vadd.f32 %v1320_v52, %v1876_v44  ;;  %v775_v55 = vpop.f32.mrb[3].mxu1 }
 0x1d9   :  { %v776_v56 = vadd.f32 %v1876_v44, %v775_v55 }
 0x1da   :  { %1413 = vtanh.f32 %v781_v53 }
 0x1db   :  { %1415 = vtanh.f32 %v776_v56  ;;  %v1323_v57 = vpop.f32.mrb[4].mxu1 }
 0x1dc   :  { %v791_v60 = vadd.f32 %v1323_v57, %v1876_v44  ;;  %v785_v62 = vpop.f32.mrb[5].mxu1 }
 0x1dd   :  { %v786_v63 = vadd.f32 %v1876_v44, %v785_v62 }
 0x1de   :  { %1417 = vtanh.f32 %v791_v60 }
 0x1df   :  { %1419 = vtanh.f32 %v786_v63  ;;  %v1326_v0 = vpop.f32.mrb[6].mxu1 }
 0x1e0   :  { %v1410_v3 = vpop.eup %1409  ;;  %v801_v4 = vadd.f32 %v1326_v0, %v1876_v44  ;;  %v795_v8 = vpop.f32.mrb[7].mxu1 }
 0x1e1   :  { %v1412_v9 = vpop.eup %1411  ;;  %v796_v11 = vadd.f32 %v1876_v44, %v795_v8  ;;  %v861_v14 = vadd.f32 %v1410_v3, %v624_v24 }
 0x1e2   :  { %1421 = vtanh.f32 %v801_v4  ;;  %v860_v12 = vadd.f32 %v1412_v9, %v623_v21 }
 0x1e3   :  { %1423 = vtanh.f32 %v796_v11  ;;  %v1329_v15 = vpop.f32.mrb[8].mxu1 }
 0x1e4   :  { %v1414_v18 = vpop.eup %1413  ;;  %v811_v19 = vadd.f32 %v1329_v15, %v1876_v44  ;;  %v805_v23 = vpop.f32.mrb[9].mxu1  ;;  %1347 = vmatprep.mubr.msk.f32.mxu1 %vm650_vm3, %v860_v12 }
 0x1e5   :  { %v1416_v28 = vpop.eup %1415  ;;  %v806_v29 = vadd.f32 %v1876_v44, %v805_v23  ;;  %1348 = vmatmul.mubr.msk.f32.vlgmr.msra.gmra.mrb[16].mxu1 %vm650_vm3, %v861_v14  ;;  %v863_v21 = vadd.f32 %v1414_v18, %v626_v34 }
 0x1e6   :  { %1425 = vtanh.f32 %v811_v19  ;;  %v862_v16 = vadd.f32 %v1416_v28, %v625_v31 }
 0x1e7   :  { %1427 = vtanh.f32 %v806_v29  ;;  %v1332_v13 = vpop.f32.mrb[10].mxu1 }
 0x1e8   :  { %v1418_v24 = vpop.eup %1417  ;;  %v821_v30 = vadd.f32 %v1332_v13, %v1876_v44  ;;  %v815_v33 = vpop.f32.mrb[11].mxu1  ;;  %1350 = vmatprep.mubr.msk.f32.mxu1 %vm650_vm3, %v862_v16 }
 0x1e9   :  { %v1420_v7 = vpop.eup %1419  ;;  %v816_v41 = vadd.f32 %v1876_v44, %v815_v33  ;;  %1351 = vmatmul.mubr.msk.f32.gmra.mrb[18].mxu1 %vm650_vm3, %v863_v21  ;;  %v865_v25 = vadd.f32 %v1418_v24, %v628_v46 }
 0x1ea   :  { %1429 = vtanh.f32 %v821_v30  ;;  %v864_v27 = vadd.f32 %v1420_v7, %v627_v43 }
 0x1eb   :  { %1431 = vtanh.f32 %v816_v41  ;;  %v1335_v31 = vpop.f32.mrb[12].mxu1 }
 0x1ec   :  { %v1422_v34 = vpop.eup %1421  ;;  %v831_v42 = vadd.f32 %v1335_v31, %v1876_v44  ;;  %v825_v45 = vpop.f32.mrb[13].mxu1  ;;  %1353 = vmatprep.mubr.msk.f32.mxu1 %vm650_vm3, %v864_v27 }
 0x1ed   :  { %v1424_v48 = vpop.eup %1423  ;;  %v826_v50 = vadd.f32 %v1876_v44, %v825_v45  ;;  %1354 = vmatmul.mubr.msk.f32.gmra.mrb[20].mxu1 %vm650_vm3, %v865_v25  ;;  %v867_v35 = vadd.f32 %v1422_v34, %v630_v58 }
 0x1ee   :  { %1433 = vtanh.f32 %v831_v42  ;;  %v866_v38 = vadd.f32 %v1424_v48, %v629_v54 }
 0x1ef   :  { %1435 = vtanh.f32 %v826_v50  ;;  %v1338_v43 = vpop.f32.mrb[14].mxu1 }
 0x1f0   :  { %v1426_v46 = vpop.eup %1425  ;;  %v841_v51 = vadd.f32 %v1338_v43, %v1876_v44  ;;  %v835_v52 = vpop.f32.mrb[15].mxu1  ;;  %1356 = vmatprep.mubr.msk.f32.mxu1 %vm650_vm3, %v866_v38 }
 0x1f1   :  { %v1428_v53 = vpop.eup %1427  ;;  %v836_v55 = vadd.f32 %v1876_v44, %v835_v52  ;;  %1357 = vmatmul.mubr.msk.f32.gmra.mrb[22].mxu1 %vm650_vm3, %v867_v35  ;;  %v869_v47 = vadd.f32 %v1426_v46, %v632_v5 }
 0x1f2   :  { %1437 = vtanh.f32 %v841_v51  ;;  %v868_v49 = vadd.f32 %v1428_v53, %v631_v1 }
 0x1f3   :  { %1439 = vtanh.f32 %v836_v55 }
 0x1f4   :  { %v1430_v54 = vpop.eup %1429  ;;  %1359 = vmatprep.mubr.msk.f32.mxu1 %vm650_vm3, %v868_v49 }
 0x1f5   :  { %v1432_v58 = vpop.eup %1431  ;;  %1360 = vmatmul.mubr.msk.f32.gmra.mrb[24].mxu1 %vm650_vm3, %v869_v47  ;;  %v871_v44 = vadd.f32 %v1430_v54, %v634_v20  ;;  %v1164_v20 = vld [vmem:[%s1967_s10] ss:$0 sm:$0xff]  ;;  %s1466_s10 = smov [#allocation2]  }
 0x1f6   :  { %v870_v56 = vadd.f32 %v1432_v58, %v633_v17  ;;  %s1101_s25 = sshll.u32 %s1466_s10, 4  ;;  %s1102_s25 = int_to_ptr.vmem [resolvable:$true] %s1101_s25 }
 0x1f7   :  { %s1441_s26 = scalar_lea.vmem %s1102_s25, 2048  ;;  %p1446_p1 = scmp.lt.s32.totalorder %s1102_s25, %s1102_s25 }
 0x1f8   :  { %v1434_v57 = vpop.eup %1433  ;;  %1362 = vmatprep.mubr.msk.f32.mxu1 %vm650_vm3, %v870_v56  ;;  %p1442_p0 = scmp.ne.s32.totalorder %s1102_s25, %s1441_s26  ;;  %p1447_p2 = scmp.lt.s32.totalorder %s1441_s26, %s1441_s26 }
 0x1f9   :  { %v1436_v61 = vpop.eup %1435  ;;  %1363 = vmatmul.mubr.msk.f32.gmra.mrb[26].mxu1 %vm650_vm3, %v871_v44  ;;  %v873_v1 = vadd.f32 %v1434_v57, %v636_v36 }
 0x1fa   :  { %v872_v59 = vadd.f32 %v1436_v61, %v635_v32  ;;  %p1448_p3 = por %p1447_p2, %p1446_p1 }
 0x1fc   :  { %v1438_v5 = vpop.eup %1437  ;;  %1365 = vmatprep.mubr.msk.f32.mxu1 %vm650_vm3, %v872_v59  ;;  %p1449_p4 = pnand %p1448_p3, %p1442_p0 }
 0x1fd   :  { %v1440_v10 = vpop.eup %1439  ;;  %1366 = vmatmul.mubr.msk.f32.gmra.mrb[28].mxu1 %vm650_vm3, %v873_v1  ;;  %v875_v17 = vadd.f32 %v1438_v5, %v638_v40 }
 0x1fe   :  { %v874_v6 = vadd.f32 %v1440_v10, %v637_v39 }
 0x200   :  { %1368 = vmatprep.mubr.msk.f32.mxu1 %vm650_vm3, %v874_v6 }
 0x201   :  { %1369 = vmatmul.mubr.msk.f32.gmra.mrb[30].mxu1 %vm650_vm3, %v875_v17 }
 0x2b8   :  { %v1349_v22 = vpop.f32.mrb[16].mxu1 }
 0x2b9   :  { %v1007_v26 = vadd.f32 %v1349_v22, %v1164_v20  ;;  %v1001_v32 = vpop.f32.mrb[17].mxu1 }
 0x2ba   :  { %v1002_v36 = vadd.f32 %v1164_v20, %v1001_v32 }
 0x2bb   :  { %1081 = vst [vmem:[#allocation2 + $0x8] sm:$0xff] %v1007_v26 }
 0x2bc   :  { %1080 = vst [vmem:[#allocation2] sm:$0xff] %v1002_v36  ;;  %v1352_v60 = vpop.f32.mrb[18].mxu1 }
 0x2bd   :  { %v1017_v37 = vadd.f32 %v1352_v60, %v1164_v20  ;;  %v1011_v39 = vpop.f32.mrb[19].mxu1 }
 0x2be   :  { %v1012_v62 = vadd.f32 %v1164_v20, %v1011_v39 }
 0x2bf   :  { %1083 = vst [vmem:[#allocation2 + $0x18] sm:$0xff] %v1017_v37 }
 0x2c0   :  { %1082 = vst [vmem:[#allocation2 + $0x10] sm:$0xff] %v1012_v62  ;;  %v1355_v2 = vpop.f32.mrb[20].mxu1 }
 0x2c1   :  { %v1027_v40 = vadd.f32 %v1355_v2, %v1164_v20  ;;  %v1021_v63 = vpop.f32.mrb[21].mxu1 }
 0x2c2   :  { %v1022_v0 = vadd.f32 %v1164_v20, %v1021_v63 }
 0x2c3   :  { %1085 = vst [vmem:[#allocation2 + $0x28] sm:$0xff] %v1027_v40 }
 0x2c4   :  { %1084 = vst [vmem:[#allocation2 + $0x20] sm:$0xff] %v1022_v0  ;;  %v1358_v3 = vpop.f32.mrb[22].mxu1 }
 0x2c5   :  { %v1037_v4 = vadd.f32 %v1358_v3, %v1164_v20  ;;  %v1031_v8 = vpop.f32.mrb[23].mxu1 }
 0x2c6   :  { %v1032_v9 = vadd.f32 %v1164_v20, %v1031_v8 }
 0x2c7   :  { %1087 = vst [vmem:[#allocation2 + $0x38] sm:$0xff] %v1037_v4 }
 0x2c8   :  { %1086 = vst [vmem:[#allocation2 + $0x30] sm:$0xff] %v1032_v9  ;;  %v1361_v11 = vpop.f32.mrb[24].mxu1 }
 0x2c9   :  { %v1047_v12 = vadd.f32 %v1361_v11, %v1164_v20  ;;  %v1041_v14 = vpop.f32.mrb[25].mxu1 }
 0x2ca   :  { %v1042_v15 = vadd.f32 %v1164_v20, %v1041_v14 }
 0x2cb   :  { %1089 = vst [vmem:[#allocation2 + $0x48] sm:$0xff] %v1047_v12 }
 0x2cc   :  { %1088 = vst [vmem:[#allocation2 + $0x40] sm:$0xff] %v1042_v15  ;;  %v1364_v18 = vpop.f32.mrb[26].mxu1 }
 0x2cd   :  { %v1057_v19 = vadd.f32 %v1364_v18, %v1164_v20  ;;  %v1051_v23 = vpop.f32.mrb[27].mxu1 }
 0x2ce   :  { %v1052_v28 = vadd.f32 %v1164_v20, %v1051_v23 }
 0x2cf   :  { %1091 = vst [vmem:[#allocation2 + $0x58] sm:$0xff] %v1057_v19 }
 0x2d0   :  { %1090 = vst [vmem:[#allocation2 + $0x50] sm:$0xff] %v1052_v28  ;;  %v1367_v29 = vpop.f32.mrb[28].mxu1 }
 0x2d1   :  { %v1067_v16 = vadd.f32 %v1367_v29, %v1164_v20  ;;  %v1061_v13 = vpop.f32.mrb[29].mxu1 }
 0x2d2   :  { %v1062_v21 = vadd.f32 %v1164_v20, %v1061_v13 }
 0x2d3   :  { %1093 = vst [vmem:[#allocation2 + $0x68] sm:$0xff] %v1067_v16 }
 0x2d4   :  { %1092 = vst [vmem:[#allocation2 + $0x60] sm:$0xff] %v1062_v21  ;;  %v1370_v24 = vpop.f32.mrb[30].mxu1 }
 0x2d5   :  { %v1077_v30 = vadd.f32 %v1370_v24, %v1164_v20  ;;  %v1071_v33 = vpop.f32.mrb[31].mxu1 }
 0x2d6   :  { %v1072_v7 = vadd.f32 %v1164_v20, %v1071_v33 }
 0x2d7   :  { %1095 = vst [vmem:[#allocation2 + $0x78] sm:$0xff] %v1077_v30 }
 0x2d8   :  { %1094 = vst [vmem:[#allocation2 + $0x70] sm:$0xff] %v1072_v7 }
 0x2d9   :  { %1452 = shalt.err (!%p1449_p4)
}
 0x2da   :  { %s1453_s28 = scalar_lea.hbm %s1968_s11, 2048 }
 0x2db   :  { %p1454_p5 = scmp.ne.s32.totalorder %s1968_s11, %s1453_s28  ;;  %p1457_p6 = scmp.lt.u32.totalorder %s1453_s28, %s1968_s11 }
 0x2dd   :  { %p1459_p7 = pnand %p1457_p6, %p1454_p5 }
 0x2df   :  { %1462 = shalt.err (!%p1459_p7)
}
 0x2e0   :  { %s1467_s13 = smov 128   ;;  %s1468_s14 = smov 8  }
 0x2e1   :  { %1107 = dma.vmem_to_hbm [thread:$0]  %s1102_s25, 2048, %s1968_s11, [#allocation3], %s1467_s13, %s1467_s13, %s1468_s14  }
 0x2e2   :  { %1463 = dma.done.wait [#allocation3], 2048  }
 0x2e3   :  { %1464 = vsyncadd [#allocation3], 4294965248 }
 0x2e4   :  { %1111 = vsyncpa [#allocation3], 1 }

</bundles_post_ra>
